<compile_context>
chip_gen: v6e
topology: v6e:2x2x1
jax: 0.10.0
libtpu: 0.0.40
codegen_flags: <defaults>
</compile_context>

<pallas_src>
import functools

import jax
import jax.numpy as jnp
from jax.experimental import pallas as pl
from jax.experimental.pallas import tpu as pltpu

NEG_BIG = -1e30  # additive mask bias for non-edges


def _leaky_relu(x, slope=0.2):
    return jnp.where(x > 0, x, slope * x)


def _elu(x):
    return jnp.where(x > 0, x, jnp.exp(x) - 1.0)


# ---------------------------------------------------------------------------
# Kernel 1: layer-1 projection (grid over node blocks).
#   feat1[h, n, :D] = (x @ W1_h)[n]        (bf16, MXU)
#   feat1[h, n,  D] = 1.0                  (ones lane -> softmax row-sum via MXU)
#   es1[n, h] = x[n] @ (W1_h @ a1_src_h)   (attention vector folded into matmul)
#   ed1[n, h] = x[n] @ (W1_h @ a1_dst_h)
# ---------------------------------------------------------------------------
def _proj1_kernel(n_heads, d_hidden, d_agg,
                  x_ref, w1_ref, c1s_ref, c1d_ref,
                  feat_ref, es_ref, ed_ref):
    x = x_ref[...]                                        # [tn, F] f32
    xb = x.astype(jnp.bfloat16)
    ones_col = (jax.lax.broadcasted_iota(jnp.int32, (1, d_agg), 1)
                == d_hidden).astype(jnp.float32)          # 1.0 at lane D
    for h in range(n_heads):
        z = jnp.dot(xb, w1_ref[h], preferred_element_type=jnp.float32)  # [tn, Dagg]
        feat_ref[h] = (z + ones_col).astype(jnp.bfloat16)
    es_ref[...] = jnp.dot(x, c1s_ref[...], preferred_element_type=jnp.float32)  # [tn, H]
    ed_ref[...] = jnp.dot(x, c1d_ref[...], preferred_element_type=jnp.float32)  # [tn, H]


# ---------------------------------------------------------------------------
# Kernel 2: layer-1 masked attention + aggregation (+ bias, ELU), fused with the
# layer-2 projection and the folded layer-2 attention vectors.
# grid = (i target blocks [parallel], j source blocks [arbitrary]).
# ---------------------------------------------------------------------------
def _attn1_kernel(n_heads, d_hidden, d_agg, n_classes, c_pad,
                  adj_ref, ed_ref, es_ref, feat_ref,
                  b1_ref, w2_ref, c2s_ref, c2d_ref,
                  feat2_ref, es2_ref, ed2_ref,
                  m_sc, acc_sc):
    j = pl.program_id(1)

    @pl.when(j == 0)
    def _init():
        m_sc[...] = jnp.full(m_sc.shape, -jnp.inf, m_sc.dtype)
        acc_sc[...] = jnp.zeros(acc_sc.shape, acc_sc.dtype)

    # additive mask bias: computed once per (i, j) tile, shared by all heads
    bias = jnp.where(adj_ref[...] > 0, 0.0, NEG_BIG)      # [ti, tj] f32
    ed = ed_ref[...]                                      # [ti, H]
    es = es_ref[...]                                      # [H, tj]

    for h in range(n_heads):
        logits = _leaky_relu(ed[:, h:h + 1] + es[h:h + 1, :]) + bias     # [ti, tj]
        m_prev = m_sc[h]                                                 # [ti, 1]
        m_new = jnp.maximum(m_prev, jnp.max(logits, axis=-1, keepdims=True))
        corr = jnp.exp(m_prev - m_new)
        p = jnp.exp(logits - m_new).astype(jnp.bfloat16)                 # [ti, tj]
        acc_sc[h] = corr * acc_sc[h] + jnp.dot(
            p, feat_ref[h], preferred_element_type=jnp.float32)          # [ti, Dagg]
        m_sc[h] = m_new

    @pl.when(j == pl.num_programs(1) - 1)
    def _finalize():
        ti = acc_sc.shape[1]
        f2 = jnp.zeros((ti, c_pad), jnp.float32)
        es2 = jnp.zeros((ti, 1), jnp.float32)
        ed2 = jnp.zeros((ti, 1), jnp.float32)
        for h in range(n_heads):
            acc = acc_sc[h]                                               # [ti, Dagg]
            inv_l = pl.reciprocal(acc[:, d_hidden:d_agg], approx=True)    # [ti, 1]
            hid = _elu(acc[:, :d_hidden] * inv_l + b1_ref[h])             # [ti, D]
            hid_b = hid.astype(jnp.bfloat16)
            f2 = f2 + jnp.dot(hid_b, w2_ref[h], preferred_element_type=jnp.float32)
            es2 = es2 + jnp.dot(hid, c2s_ref[h], preferred_element_type=jnp.float32)
            ed2 = ed2 + jnp.dot(hid, c2d_ref[h], preferred_element_type=jnp.float32)
        # ones lane at index n_classes -> layer-2 softmax denominator via MXU
        ones_col = (jax.lax.broadcasted_iota(jnp.int32, (1, c_pad), 1)
                    == n_classes).astype(jnp.float32)
        feat2_ref[...] = (f2 + ones_col).astype(jnp.bfloat16)            # [ti, C_PAD]
        es2_ref[...] = es2
        ed2_ref[...] = ed2


# ---------------------------------------------------------------------------
# Kernel 3: layer-2 masked attention + aggregation + bias (single head).
# ---------------------------------------------------------------------------
def _attn2_kernel(n_classes, c_pad,
                  adj_ref, ed_ref, es_ref, feat_ref, b2_ref,
                  out_ref, m_sc, acc_sc):
    j = pl.program_id(1)

    @pl.when(j == 0)
    def _init():
        m_sc[...] = jnp.full(m_sc.shape, -jnp.inf, m_sc.dtype)
        acc_sc[...] = jnp.zeros(acc_sc.shape, acc_sc.dtype)

    bias = jnp.where(adj_ref[...] > 0, 0.0, NEG_BIG)                     # [ti, tj]
    logits = _leaky_relu(ed_ref[...] + es_ref[...]) + bias               # [ti, tj]
    m_prev = m_sc[...]
    m_new = jnp.maximum(m_prev, jnp.max(logits, axis=-1, keepdims=True))
    corr = jnp.exp(m_prev - m_new)
    p = jnp.exp(logits - m_new).astype(jnp.bfloat16)
    acc_sc[...] = corr * acc_sc[...] + jnp.dot(
        p, feat_ref[...], preferred_element_type=jnp.float32)            # [ti, C_PAD]
    m_sc[...] = m_new

    @pl.when(j == pl.num_programs(1) - 1)
    def _finalize():
        acc = acc_sc[...]
        inv_l = pl.reciprocal(acc[:, n_classes:n_classes + 1], approx=True)
        out_ref[...] = acc * inv_l + b2_ref[...]                         # [ti, C_PAD]


def _round_up(x, m):
    return (x + m - 1) // m * m


def gat_forward(x, edge_index, params, *, n_heads, n_hidden, n_classes, tile=128):
    """Two-layer GAT forward (eval mode). x: [N, F] f32, edge_index: [2, E] int32."""
    n, f = x.shape
    h_, d, c = n_heads, n_hidden, n_classes
    d_agg = d + 1          # per-head value lanes + ones lane (row sum)
    c_pad = 128            # lane-dense layer-2 feature / output width
    assert c + 1 <= c_pad
    n_pad = max(_round_up(n, tile), tile)
    nb = n_pad // tile
    f32, bf16 = jnp.float32, jnp.bfloat16

    # ---- graph glue: dense int8 adjacency (rows = target i, cols = source j) ----
    src, dst = edge_index[0], edge_index[1]
    diag = jnp.arange(n_pad)
    adj = jnp.zeros((n_pad, n_pad), jnp.int8)
    adj = adj.at[diag, diag].set(1)            # self loops (PyG default; keeps pad rows valid)
    adj = adj.at[dst, src].set(1)

    xp = jnp.zeros((n_pad, f), f32).at[:n, :].set(x.astype(f32))

    # ---- parameter prep: fold attention vectors into the projections ----
    w1r = params["w1"].reshape(f, h_, d)                                  # [F, H, D]
    w1b = jnp.transpose(w1r, (1, 0, 2))                                   # [H, F, D]
    w1b = jnp.pad(w1b, ((0, 0), (0, 0), (0, 1))).astype(bf16)             # [H, F, Dagg]
    c1s = jnp.einsum("fhd,hd->fh", w1r, params["a1_src"]).astype(f32)     # [F, H]
    c1d = jnp.einsum("fhd,hd->fh", w1r, params["a1_dst"]).astype(f32)     # [F, H]
    b1r = params["b1"].reshape(h_, d)[:, None, :].astype(f32)             # [H, 1, D]

    w2r = params["w2"].reshape(h_, d, c)                                  # [H, D, C]
    w2p = jnp.pad(w2r, ((0, 0), (0, 0), (0, c_pad - c))).astype(bf16)     # [H, D, C_PAD]
    c2s = jnp.einsum("hdc,c->hd", w2r, params["a2_src"][0])[..., None].astype(f32)
    c2d = jnp.einsum("hdc,c->hd", w2r, params["a2_dst"][0])[..., None].astype(f32)
    b2p = jnp.pad(params["b2"], ((0, 0), (0, c_pad - c))).astype(f32)     # [1, C_PAD]

    # ---- layer-1 projection ----
    feat1, es1, ed1 = pl.pallas_call(
        functools.partial(_proj1_kernel, h_, d, d_agg),
        grid=(nb,),
        in_specs=[
            pl.BlockSpec((tile, f), lambda i: (i, 0)),
            pl.BlockSpec((h_, f, d_agg), lambda i: (0, 0, 0)),
            pl.BlockSpec((f, h_), lambda i: (0, 0)),
            pl.BlockSpec((f, h_), lambda i: (0, 0)),
        ],
        out_specs=[
            pl.BlockSpec((h_, tile, d_agg), lambda i: (0, i, 0)),
            pl.BlockSpec((tile, h_), lambda i: (i, 0)),
            pl.BlockSpec((tile, h_), lambda i: (i, 0)),
        ],
        out_shape=[
            jax.ShapeDtypeStruct((h_, n_pad, d_agg), bf16),
            jax.ShapeDtypeStruct((n_pad, h_), f32),
            jax.ShapeDtypeStruct((n_pad, h_), f32),
        ],
        compiler_params=pltpu.CompilerParams(dimension_semantics=("parallel",)),
    )(xp, w1b, c1s, c1d)

    es1_row = es1.T          # [H, N_pad]: source e values in lane-major layout

    # ---- layer-1 attention + aggregation (+ ELU) fused with layer-2 projection ----
    flops1 = 2 * n_pad * n_pad * h_ * d_agg + 2 * n_pad * h_ * d * (c_pad + 2)
    feat2, es2, ed2 = pl.pallas_call(
        functools.partial(_attn1_kernel, h_, d, d_agg, c, c_pad),
        grid=(nb, nb),
        in_specs=[
            pl.BlockSpec((tile, tile), lambda i, j: (i, j)),          # adj (int8)
            pl.BlockSpec((tile, h_), lambda i, j: (i, 0)),            # e_dst (target blk)
            pl.BlockSpec((h_, tile), lambda i, j: (0, j)),            # e_src (source blk)
            pl.BlockSpec((h_, tile, d_agg), lambda i, j: (0, j, 0)),  # feat1 (source blk)
            pl.BlockSpec((h_, 1, d), lambda i, j: (0, 0, 0)),         # b1
            pl.BlockSpec((h_, d, c_pad), lambda i, j: (0, 0, 0)),     # W2 (lane-padded)
            pl.BlockSpec((h_, d, 1), lambda i, j: (0, 0, 0)),         # W2 @ a2_src
            pl.BlockSpec((h_, d, 1), lambda i, j: (0, 0, 0)),         # W2 @ a2_dst
        ],
        out_specs=[
            pl.BlockSpec((tile, c_pad), lambda i, j: (i, 0)),
            pl.BlockSpec((tile, 1), lambda i, j: (i, 0)),
            pl.BlockSpec((tile, 1), lambda i, j: (i, 0)),
        ],
        out_shape=[
            jax.ShapeDtypeStruct((n_pad, c_pad), bf16),   # layer-2 features (lane-padded)
            jax.ShapeDtypeStruct((n_pad, 1), f32),        # layer-2 e_src
            jax.ShapeDtypeStruct((n_pad, 1), f32),        # layer-2 e_dst
        ],
        scratch_shapes=[
            pltpu.VMEM((h_, tile, 1), f32),               # running max (per head)
            pltpu.VMEM((h_, tile, d_agg), f32),           # running [acc | row-sum] (per head)
        ],
        compiler_params=pltpu.CompilerParams(
            dimension_semantics=("parallel", "arbitrary"),
            vmem_limit_bytes=32 * 1024 * 1024),
        cost_estimate=pl.CostEstimate(
            flops=int(flops1),
            transcendentals=int(n_pad * n_pad * h_),
            bytes_accessed=int(n_pad * n_pad + nb * h_ * n_pad * d_agg * 2
                               + n_pad * (2 * c_pad + 8 * h_ + 8))),
    )(adj, ed1, es1_row, feat1, b1r, w2p, c2s, c2d)

    es2_row = es2.T          # [1, N_pad]

    # ---- layer-2 attention + aggregation + bias ----
    out_pad = pl.pallas_call(
        functools.partial(_attn2_kernel, c, c_pad),
        grid=(nb, nb),
        in_specs=[
            pl.BlockSpec((tile, tile), lambda i, j: (i, j)),      # adj (int8)
            pl.BlockSpec((tile, 1), lambda i, j: (i, 0)),         # e_dst
            pl.BlockSpec((1, tile), lambda i, j: (0, j)),         # e_src
            pl.BlockSpec((tile, c_pad), lambda i, j: (j, 0)),     # layer-2 features
            pl.BlockSpec((1, c_pad), lambda i, j: (0, 0)),        # b2 (lane-padded)
        ],
        out_specs=pl.BlockSpec((tile, c_pad), lambda i, j: (i, 0)),
        out_shape=jax.ShapeDtypeStruct((n_pad, c_pad), f32),
        scratch_shapes=[
            pltpu.VMEM((tile, 1), f32),
            pltpu.VMEM((tile, c_pad), f32),
        ],
        compiler_params=pltpu.CompilerParams(
            dimension_semantics=("parallel", "arbitrary"),
            vmem_limit_bytes=32 * 1024 * 1024),
        cost_estimate=pl.CostEstimate(
            flops=int(2 * n_pad * n_pad * c_pad),
            transcendentals=int(n_pad * n_pad),
            bytes_accessed=int(n_pad * n_pad + nb * n_pad * c_pad * 2
                               + n_pad * c_pad * 4)),
    )(adj, ed2, es2_row, feat2, b2p)

    return out_pad[:n, :c]


# ---------------------------------------------------------------------------
# Pure-JAX f32 reference (PyG GATConv eval semantics) for validation.
# ---------------------------------------------------------------------------
def gat_reference(x, edge_index, params, *, n_heads, n_hidden, n_classes):
    n = x.shape[0]
    h_, d = n_heads, n_hidden
    src, dst = edge_index[0], edge_index[1]
    adj = jnp.zeros((n, n), jnp.float32).at[dst, src].set(1.0)
    adj = jnp.maximum(adj, jnp.eye(n, dtype=jnp.float32))

    def layer(feats, a_src, a_dst):
        es = feats @ a_src
        ed = feats @ a_dst
        logits = _leaky_relu(ed[:, None] + es[None, :])
        logits = jnp.where(adj > 0, logits, jnp.float32(NEG_BIG))
        alpha = jax.nn.softmax(logits, axis=-1)
        return alpha @ feats

    h1 = x @ params["w1"]
    outs = []
    for h in range(h_):
        hh = h1[:, h * d:(h + 1) * d]
        outs.append(layer(hh, params["a1_src"][h], params["a1_dst"][h]))
    hidden = _elu(jnp.concatenate(outs, axis=-1) + params["b1"])
    # dropout p=0.6: eval mode -> identity
    h2 = hidden @ params["w2"]
    return layer(h2, params["a2_src"][0], params["a2_dst"][0]) + params["b2"]


def init_params(key, n_features, n_hidden, n_classes, n_heads):
    ks = jax.random.split(key, 8)
    s = 0.2
    return {
        "w1": s * jax.random.normal(ks[0], (n_features, n_heads * n_hidden), jnp.float32),
        "a1_src": s * jax.random.normal(ks[1], (n_heads, n_hidden), jnp.float32),
        "a1_dst": s * jax.random.normal(ks[2], (n_heads, n_hidden), jnp.float32),
        "b1": s * jax.random.normal(ks[3], (1, n_heads * n_hidden), jnp.float32),
        "w2": s * jax.random.normal(ks[4], (n_heads * n_hidden, n_classes), jnp.float32),
        "a2_src": s * jax.random.normal(ks[5], (1, n_classes), jnp.float32),
        "a2_dst": s * jax.random.normal(ks[6], (1, n_classes), jnp.float32),
        "b2": s * jax.random.normal(ks[7], (1, n_classes), jnp.float32),
    }


if __name__ == "__main__":
    key = jax.random.PRNGKey(0)
    n_nodes, n_features, n_hidden, n_heads, n_classes = 8, 16, 8, 4, 4

    k_x, k_p = jax.random.split(key)
    x = jax.random.normal(k_x, (n_nodes, n_features), jnp.float32)

    # deterministic small graph: directed ring both ways + a few chords
    src = jnp.array([0, 1, 2, 3, 4, 5, 6, 7, 1, 2, 3, 4, 5, 6, 7, 0, 0, 2, 5, 3], jnp.int32)
    dst = jnp.array([1, 2, 3, 4, 5, 6, 7, 0, 0, 1, 2, 3, 4, 5, 6, 7, 4, 6, 1, 7], jnp.int32)
    edge_index = jnp.stack([src, dst], axis=0)

    params = init_params(k_p, n_features, n_hidden, n_classes, n_heads)

    out = gat_forward(x, edge_index, params,
                      n_heads=n_heads, n_hidden=n_hidden, n_classes=n_classes)
    out = jax.block_until_ready(out)
    assert out.shape == (n_nodes, n_classes) and out.dtype == jnp.float32

    ref = gat_reference(x, edge_index, params,
                        n_heads=n_heads, n_hidden=n_hidden, n_classes=n_classes)
    err = float(jnp.max(jnp.abs(out - ref)))
    assert err < 7.5e-2, f"kernel vs reference mismatch: max abs err = {err}"
    print("KERNEL_OK")
</pallas_src>

<mosaic_0001>
module attributes {stable_mosaic.version = 11 : i64} {
  func.func @_proj1_kernel(%arg0: i32, %arg1: memref<128x16xf32, #tpu.memory_space<vmem>>, %arg2: memref<4x16x9xbf16, #tpu.memory_space<vmem>>, %arg3: memref<16x4xf32, #tpu.memory_space<vmem>>, %arg4: memref<16x4xf32, #tpu.memory_space<vmem>>, %arg5: memref<4x128x9xbf16, #tpu.memory_space<vmem>>, %arg6: memref<128x4xf32, #tpu.memory_space<vmem>>, %arg7: memref<128x4xf32, #tpu.memory_space<vmem>>) attributes {dimension_semantics = [#tpu.dimension_semantics<parallel>], iteration_bounds = array<i64: 1>, scalar_prefetch = 0 : i64, scratch_operands = 0 : i64, tpu.core_type = #tpu.core_type<tc>, window_params = [{transform_indices = @transform_0, window_bounds = array<i64: 128, 16>}, {pipeline_mode = #tpu.pipeline_mode<synchronous>, transform_indices = @transform_1, window_bounds = array<i64: 4, 16, 9>}, {pipeline_mode = #tpu.pipeline_mode<synchronous>, transform_indices = @transform_2, window_bounds = array<i64: 16, 4>}, {pipeline_mode = #tpu.pipeline_mode<synchronous>, transform_indices = @transform_3, window_bounds = array<i64: 16, 4>}, {transform_indices = @transform_4, window_bounds = array<i64: 4, 128, 9>}, {transform_indices = @transform_5, window_bounds = array<i64: 128, 4>}, {transform_indices = @transform_6, window_bounds = array<i64: 128, 4>}]} {
    %c0 = arith.constant 0 : index
    %c0_0 = arith.constant 0 : index
    %0 = vector.load %arg1[%c0, %c0_0] : memref<128x16xf32, #tpu.memory_space<vmem>>, vector<128x16xf32>
    %1 = arith.truncf %0 : vector<128x16xf32> to vector<128x16xbf16>
    %2 = tpu.iota {dimensions = array<i32: 1>} : vector<1x9xi32>
    %c8_i32 = arith.constant 8 : i32
    %3 = vector.broadcast %c8_i32 : i32 to vector<1x9xi32>
    %4 = arith.cmpi eq, %2, %3 : vector<1x9xi32>
    %5 = arith.extui %4 : vector<1x9xi1> to vector<1x9xi32>
    %6 = arith.sitofp %5 : vector<1x9xi32> to vector<1x9xf32>
    %c0_1 = arith.constant 0 : index
    %c0_2 = arith.constant 0 : index
    %c0_3 = arith.constant 0 : index
    %7 = vector.load %arg2[%c0_1, %c0_2, %c0_3] : memref<4x16x9xbf16, #tpu.memory_space<vmem>>, vector<1x16x9xbf16>
    %8 = vector.shape_cast %7 : vector<1x16x9xbf16> to vector<16x9xbf16>
    %cst = arith.constant dense<0.000000e+00> : vector<128x9xf32>
    %9 = tpu.matmul %1, %8, %cst {dimension_numbers = #tpu.dot_dimension_numbers<[1], [0], [0], [1], [0, 0, 1, 1], [], []>} : vector<128x16xbf16>, vector<16x9xbf16>, vector<128x9xf32> -> vector<128x9xf32>
    %10 = vector.broadcast %6 : vector<1x9xf32> to vector<128x9xf32>
    %11 = arith.addf %9, %10 : vector<128x9xf32>
    %12 = arith.truncf %11 : vector<128x9xf32> to vector<128x9xbf16>
    %c0_4 = arith.constant 0 : index
    %c0_5 = arith.constant 0 : index
    %c0_6 = arith.constant 0 : index
    %13 = vector.load %arg5[%c0_4, %c0_5, %c0_6] : memref<4x128x9xbf16, #tpu.memory_space<vmem>>, vector<1x128x9xbf16>
    %14 = vector.shape_cast %13 : vector<1x128x9xbf16> to vector<128x9xbf16>
    %15 = vector.shape_cast %12 : vector<128x9xbf16> to vector<1x128x9xbf16>
    tpu.vector_store %arg5[%c0_4, %c0_5, %c0_6], %15 {strides = array<i32>} : memref<4x128x9xbf16, #tpu.memory_space<vmem>>, vector<1x128x9xbf16>,
    %c1 = arith.constant 1 : index
    %c0_7 = arith.constant 0 : index
    %c0_8 = arith.constant 0 : index
    %16 = vector.load %arg2[%c1, %c0_7, %c0_8] : memref<4x16x9xbf16, #tpu.memory_space<vmem>>, vector<1x16x9xbf16>
    %17 = vector.shape_cast %16 : vector<1x16x9xbf16> to vector<16x9xbf16>
    %cst_9 = arith.constant dense<0.000000e+00> : vector<128x9xf32>
    %18 = tpu.matmul %1, %17, %cst_9 {dimension_numbers = #tpu.dot_dimension_numbers<[1], [0], [0], [1], [0, 0, 1, 1], [], []>} : vector<128x16xbf16>, vector<16x9xbf16>, vector<128x9xf32> -> vector<128x9xf32>
    %19 = vector.broadcast %6 : vector<1x9xf32> to vector<128x9xf32>
    %20 = arith.addf %18, %19 : vector<128x9xf32>
    %21 = arith.truncf %20 : vector<128x9xf32> to vector<128x9xbf16>
    %c1_10 = arith.constant 1 : index
    %c0_11 = arith.constant 0 : index
    %c0_12 = arith.constant 0 : index
    %22 = vector.load %arg5[%c1_10, %c0_11, %c0_12] : memref<4x128x9xbf16, #tpu.memory_space<vmem>>, vector<1x128x9xbf16>
    %23 = vector.shape_cast %22 : vector<1x128x9xbf16> to vector<128x9xbf16>
    %24 = vector.shape_cast %21 : vector<128x9xbf16> to vector<1x128x9xbf16>
    tpu.vector_store %arg5[%c1_10, %c0_11, %c0_12], %24 {strides = array<i32>} : memref<4x128x9xbf16, #tpu.memory_space<vmem>>, vector<1x128x9xbf16>,
    %c2 = arith.constant 2 : index
    %c0_13 = arith.constant 0 : index
    %c0_14 = arith.constant 0 : index
    %25 = vector.load %arg2[%c2, %c0_13, %c0_14] : memref<4x16x9xbf16, #tpu.memory_space<vmem>>, vector<1x16x9xbf16>
    %26 = vector.shape_cast %25 : vector<1x16x9xbf16> to vector<16x9xbf16>
    %cst_15 = arith.constant dense<0.000000e+00> : vector<128x9xf32>
    %27 = tpu.matmul %1, %26, %cst_15 {dimension_numbers = #tpu.dot_dimension_numbers<[1], [0], [0], [1], [0, 0, 1, 1], [], []>} : vector<128x16xbf16>, vector<16x9xbf16>, vector<128x9xf32> -> vector<128x9xf32>
    %28 = vector.broadcast %6 : vector<1x9xf32> to vector<128x9xf32>
    %29 = arith.addf %27, %28 : vector<128x9xf32>
    %30 = arith.truncf %29 : vector<128x9xf32> to vector<128x9xbf16>
    %c2_16 = arith.constant 2 : index
    %c0_17 = arith.constant 0 : index
    %c0_18 = arith.constant 0 : index
    %31 = vector.load %arg5[%c2_16, %c0_17, %c0_18] : memref<4x128x9xbf16, #tpu.memory_space<vmem>>, vector<1x128x9xbf16>
    %32 = vector.shape_cast %31 : vector<1x128x9xbf16> to vector<128x9xbf16>
    %33 = vector.shape_cast %30 : vector<128x9xbf16> to vector<1x128x9xbf16>
    tpu.vector_store %arg5[%c2_16, %c0_17, %c0_18], %33 {strides = array<i32>} : memref<4x128x9xbf16, #tpu.memory_space<vmem>>, vector<1x128x9xbf16>,
    %c3 = arith.constant 3 : index
    %c0_19 = arith.constant 0 : index
    %c0_20 = arith.constant 0 : index
    %34 = vector.load %arg2[%c3, %c0_19, %c0_20] : memref<4x16x9xbf16, #tpu.memory_space<vmem>>, vector<1x16x9xbf16>
    %35 = vector.shape_cast %34 : vector<1x16x9xbf16> to vector<16x9xbf16>
    %cst_21 = arith.constant dense<0.000000e+00> : vector<128x9xf32>
    %36 = tpu.matmul %1, %35, %cst_21 {dimension_numbers = #tpu.dot_dimension_numbers<[1], [0], [0], [1], [0, 0, 1, 1], [], []>} : vector<128x16xbf16>, vector<16x9xbf16>, vector<128x9xf32> -> vector<128x9xf32>
    %37 = vector.broadcast %6 : vector<1x9xf32> to vector<128x9xf32>
    %38 = arith.addf %36, %37 : vector<128x9xf32>
    %39 = arith.truncf %38 : vector<128x9xf32> to vector<128x9xbf16>
    %c3_22 = arith.constant 3 : index
    %c0_23 = arith.constant 0 : index
    %c0_24 = arith.constant 0 : index
    %40 = vector.load %arg5[%c3_22, %c0_23, %c0_24] : memref<4x128x9xbf16, #tpu.memory_space<vmem>>, vector<1x128x9xbf16>
    %41 = vector.shape_cast %40 : vector<1x128x9xbf16> to vector<128x9xbf16>
    %42 = vector.shape_cast %39 : vector<128x9xbf16> to vector<1x128x9xbf16>
    tpu.vector_store %arg5[%c3_22, %c0_23, %c0_24], %42 {strides = array<i32>} : memref<4x128x9xbf16, #tpu.memory_space<vmem>>, vector<1x128x9xbf16>,
    %c0_25 = arith.constant 0 : index
    %c0_26 = arith.constant 0 : index
    %43 = vector.load %arg3[%c0_25, %c0_26] : memref<16x4xf32, #tpu.memory_space<vmem>>, vector<16x4xf32>
    %cst_27 = arith.constant dense<0.000000e+00> : vector<128x4xf32>
    %44 = tpu.matmul %0, %43, %cst_27 {dimension_numbers = #tpu.dot_dimension_numbers<[1], [0], [0], [1], [0, 0, 1, 1], [], []>} : vector<128x16xf32>, vector<16x4xf32>, vector<128x4xf32> -> vector<128x4xf32>
    %c0_28 = arith.constant 0 : index
    %c0_29 = arith.constant 0 : index
    %45 = vector.load %arg6[%c0_28, %c0_29] : memref<128x4xf32, #tpu.memory_space<vmem>>, vector<128x4xf32>
    tpu.vector_store %arg6[%c0_28, %c0_29], %44 {strides = array<i32>} : memref<128x4xf32, #tpu.memory_space<vmem>>, vector<128x4xf32>,
    %c0_30 = arith.constant 0 : index
    %c0_31 = arith.constant 0 : index
    %46 = vector.load %arg4[%c0_30, %c0_31] : memref<16x4xf32, #tpu.memory_space<vmem>>, vector<16x4xf32>
    %cst_32 = arith.constant dense<0.000000e+00> : vector<128x4xf32>
    %47 = tpu.matmul %0, %46, %cst_32 {dimension_numbers = #tpu.dot_dimension_numbers<[1], [0], [0], [1], [0, 0, 1, 1], [], []>} : vector<128x16xf32>, vector<16x4xf32>, vector<128x4xf32> -> vector<128x4xf32>
    %c0_33 = arith.constant 0 : index
    %c0_34 = arith.constant 0 : index
    %48 = vector.load %arg7[%c0_33, %c0_34] : memref<128x4xf32, #tpu.memory_space<vmem>>, vector<128x4xf32>
    tpu.vector_store %arg7[%c0_33, %c0_34], %47 {strides = array<i32>} : memref<128x4xf32, #tpu.memory_space<vmem>>, vector<128x4xf32>,
    return
  }
  func.func @transform_0(%arg0: i32) -> (i32, i32) {
    %c0_i32 = arith.constant 0 : i32
    %c0_i32_0 = arith.constant 0 : i32
    return %arg0, %c0_i32 : i32, i32
  }
  func.func @transform_1(%arg0: i32) -> (i32, i32, i32) {
    %c0_i32 = arith.constant 0 : i32
    %c0_i32_0 = arith.constant 0 : i32
    %c0_i32_1 = arith.constant 0 : i32
    %c0_i32_2 = arith.constant 0 : i32
    return %c0_i32, %c0_i32_0, %c0_i32_1 : i32, i32, i32
  }
  func.func @transform_2(%arg0: i32) -> (i32, i32) {
    %c0_i32 = arith.constant 0 : i32
    %c0_i32_0 = arith.constant 0 : i32
    %c0_i32_1 = arith.constant 0 : i32
    return %c0_i32, %c0_i32_0 : i32, i32
  }
  func.func @transform_3(%arg0: i32) -> (i32, i32) {
    %c0_i32 = arith.constant 0 : i32
    %c0_i32_0 = arith.constant 0 : i32
    %c0_i32_1 = arith.constant 0 : i32
    return %c0_i32, %c0_i32_0 : i32, i32
  }
  func.func @transform_4(%arg0: i32) -> (i32, i32, i32) {
    %c0_i32 = arith.constant 0 : i32
    %c0_i32_0 = arith.constant 0 : i32
    %c0_i32_1 = arith.constant 0 : i32
    return %c0_i32, %arg0, %c0_i32_0 : i32, i32, i32
  }
  func.func @transform_5(%arg0: i32) -> (i32, i32) {
    %c0_i32 = arith.constant 0 : i32
    %c0_i32_0 = arith.constant 0 : i32
    return %arg0, %c0_i32 : i32, i32
  }
  func.func @transform_6(%arg0: i32) -> (i32, i32) {
    %c0_i32 = arith.constant 0 : i32
    %c0_i32_0 = arith.constant 0 : i32
    return %arg0, %c0_i32 : i32, i32
  }
}

</mosaic_0001>

<bundles_post_ra>
// kernel: tpu_custom_call.1
= control target key start
LH: loop header
LB: loop body
LE: loop exit
PB: predicated region body
PF: predicated region fallthrough
CT: control target
= control target key end

     0   :  { %vm58_vm0 = vcmask 130048   ;;  %v45_v32 = vlaneseq  ;;  %v1665_v34 = vmov 0.0   ;;  %vm244_vm2 = vcmask 68608   ;;  %s2342_s1 = inlined_call_operand.vmem [shape: bf16[4,16,9], index: 1, kind: input, shape index: {}]   ;;  %s2343_s0 = inlined_call_operand.vmem [shape: f32[128,16], index: 0, kind: input, shape index: {}]   ;;  %s2344_s2 = inlined_call_operand.vmem [shape: f32[16,4], index: 2, kind: input, shape index: {}]   ;;  %s2345_s3 = inlined_call_operand.vmem [shape: f32[16,4], index: 3, kind: input, shape index: {}]   ;;  %s2346_s4 = inlined_call_operand.vmem [shape: bf16[4,128,9], index: 4, kind: output, shape index: {0}]   ;;  %s2347_s5 = inlined_call_operand.vmem [shape: f32[128,4], index: 5, kind: output, shape index: {1}]   ;;  %s2348_s6 = inlined_call_operand.vmem [shape: f32[128,4], index: 6, kind: output, shape index: {2}]  }
   0x1   :  { %v1661_v0 = vld [vmem:[%s2342_s1] sm:$0xff]   ;;  %v1662_v1 = vld [vmem:[%s2342_s1 + $0x8] sm:$0xff]   ;;  %v1720_v4 = vld [vmem:[%s2343_s0 + $0x10] sm:$0xff]  ;;  %vm1017_vm3 = vcmask 31744  }
   0x2   :  { %1532 = vmatprep.subr.bf16.mxu0 %v1661_v0  ;;  %v1710_v2 = vld [vmem:[%s2343_s0] sm:$0xff]  ;;  %v1715_v3 = vld [vmem:[%s2343_s0 + $0x8] sm:$0xff]  ;;  %1550 = vmatprep.subr.bf16.mxu1 %v1662_v1  ;;  %v1727_v6 = vld [vmem:[%s2343_s0 + $0x18] sm:$0xff]  ;;  %v46_v33 = vand.u32 127, %v45_v32 }
   0x3   :  { %1533 = vmatpush3.bf16.msra.mxu0 %v1661_v0  ;;  %v37_v5 = vpack.c.bf16 %v1715_v3, %v1710_v2  ;;  %1551 = vmatpush3.bf16.msra.mxu1 %v1662_v1  ;;  %v38_v7 = vpack.c.bf16 %v1727_v6, %v1720_v4  ;;  %v1663_v8 = vld [vmem:[%s2342_s1 + $0x10] sm:$0xff]   ;;  %v1664_v9 = vld [vmem:[%s2342_s1 + $0x18] sm:$0xff]   ;;  %v1742_v10 = vld [vmem:[%s2343_s0 + $0x20] sm:$0xff] }
   0x4   :  { %v1747_v11 = vld [vmem:[%s2343_s0 + $0x28] sm:$0xff]  ;;  %1568 = vmatprep.subr.bf16.mxu0 %v1663_v8  ;;  %1586 = vmatprep.subr.bf16.mxu1 %v1664_v9  ;;  %v1756_v13 = vld [vmem:[%s2343_s0 + $0x30] sm:$0xff]  ;;  %v1761_v14 = vld [vmem:[%s2343_s0 + $0x38] sm:$0xff]  ;;  %vm47_vm1 = vcmp.eq.s32.totalorder %v46_v33, 8 }
   0x5   :  { %1534 = vmatprep.mubr.msk.bf16.mxu0 %vm58_vm0, %v37_v5  ;;  %1552 = vmatprep.mubr.msk.bf16.mxu1 %vm58_vm0, %v37_v5  ;;  %v39_v12 = vpack.c.bf16 %v1747_v11, %v1742_v10  ;;  %v1766_v15 = vld [vmem:[%s2343_s0 + $0x40] sm:$0xff]  ;;  %v1771_v16 = vld [vmem:[%s2343_s0 + $0x48] sm:$0xff]  ;;  %v40_v19 = vpack.c.bf16 %v1761_v14, %v1756_v13  ;;  %v31_v21 = vld [vmem:[%s2343_s0 + $0x50] sm:$0xff]  ;;  %v1892_v35 = vsel %vm47_vm1, 1.0, %v1665_v34 }
   0x6   :  { %1535 = vmatmul.mubr.msk.bf16.vlgmr.msra.gmra.mxu0 %vm58_vm0, %v38_v7  ;;  %1553 = vmatmul.mubr.msk.bf16.vlgmr.msra.gmra.mxu1 %vm58_vm0, %v38_v7  ;;  %v823_v17 = vld [vmem:[%s2344_s2 + $0x8] sm:$0xff]  ;;  %v41_v20 = vpack.c.bf16 %v1771_v16, %v1766_v15  ;;  %v32_v22 = vld [vmem:[%s2343_s0 + $0x58] sm:$0xff]  ;;  %v33_v23 = vld [vmem:[%s2343_s0 + $0x60] sm:$0xff] }
   0x7   :  { %1569 = vmatpush3.bf16.msra.mxu0 %v1663_v8  ;;  %1587 = vmatpush3.bf16.msra.mxu1 %v1664_v9  ;;  %v1035_v18 = vld [vmem:[%s2345_s3 + $0x8] sm:$0xff]  ;;  %v42_v25 = vpack.c.bf16 %v32_v22, %v31_v21  ;;  %v35_v27 = vld [vmem:[%s2343_s0 + $0x70] sm:$0xff]  ;;  %v36_v28 = vld [vmem:[%s2343_s0 + $0x78] sm:$0xff] }
   0x8   :  { %1538 = vmatprep.mubr.msk.bf16.mxu0 %vm58_vm0, %v39_v12  ;;  %1556 = vmatprep.mubr.msk.bf16.mxu1 %vm58_vm0, %v39_v12  ;;  %v1801_v24 = vld [vmem:[%s2343_s0 + $0x68] sm:$0xff]  ;;  %v44_v29 = vpack.c.bf16 %v36_v28, %v35_v27  ;;  %v822_v30 = vld [vmem:[%s2344_s2] sm:$0xff] }
   0x9   :  { %1604 = vmatprep.subr.mxu0 %v823_v17  ;;  %1632 = vmatprep.subr.mxu1 %v1035_v18  ;;  %v43_v26 = vpack.c.bf16 %v1801_v24, %v33_v23  ;;  %v1034_v31 = vld [vmem:[%s2345_s3] sm:$0xff] }
   0xe   :  { %1539 = vmatmul.mubr.msk.bf16.gmra.mxu0 %vm58_vm0, %v40_v19  ;;  %1557 = vmatmul.mubr.msk.bf16.gmra.mxu1 %vm58_vm0, %v40_v19 }
   0xf   :  { %1542 = vmatprep.mubr.msk.bf16.mxu0 %vm58_vm0, %v41_v20  ;;  %1560 = vmatprep.mubr.msk.bf16.mxu1 %vm58_vm0, %v41_v20 }
  0x16   :  { %1543 = vmatmul.mubr.msk.bf16.gmra.mxu0 %vm58_vm0, %v42_v25  ;;  %1561 = vmatmul.mubr.msk.bf16.gmra.mxu1 %vm58_vm0, %v42_v25 }
  0x17   :  { %1546 = vmatprep.mubr.msk.bf16.mxu0 %vm58_vm0, %v43_v26  ;;  %1564 = vmatprep.mubr.msk.bf16.mxu1 %vm58_vm0, %v43_v26 }
  0x1e   :  { %1547 = vmatmul.mubr.msk.bf16.gmra.mxu0 %vm58_vm0, %v44_v29  ;;  %1565 = vmatmul.mubr.msk.bf16.gmra.mxu1 %vm58_vm0, %v44_v29 }
  0x1f   :  { %1570 = vmatprep.mubr.msk.bf16.mxu0 %vm58_vm0, %v37_v5  ;;  %1588 = vmatprep.mubr.msk.bf16.mxu1 %vm58_vm0, %v37_v5 }
  0x26   :  { %1571 = vmatmul.mubr.msk.bf16.vlgmr.msra.gmra.mxu0 %vm58_vm0, %v38_v7  ;;  %1589 = vmatmul.mubr.msk.bf16.vlgmr.msra.gmra.mxu1 %vm58_vm0, %v38_v7 }
  0x27   :  { %1605 = vmatpush3.msra.mxu0 %v823_v17  ;;  %1633 = vmatpush3.msra.mxu1 %v1035_v18 }
  0x28   :  { %1574 = vmatprep.mubr.msk.bf16.mxu0 %vm58_vm0, %v39_v12  ;;  %1592 = vmatprep.mubr.msk.bf16.mxu1 %vm58_vm0, %v39_v12 }
  0x29   :  { %1606 = vmatprep.subr.mxu0 %v822_v30  ;;  %1634 = vmatprep.subr.mxu1 %v1034_v31 }
  0x2a   :  { %1607 = vmatpush3.msra.mxu0 %v822_v30  ;;  %1635 = vmatpush3.msra.mxu1 %v1034_v31 }
  0x2e   :  { %1575 = vmatmul.mubr.msk.bf16.gmra.mxu0 %vm58_vm0, %v40_v19  ;;  %1593 = vmatmul.mubr.msk.bf16.gmra.mxu1 %vm58_vm0, %v40_v19 }
  0x2f   :  { %1578 = vmatprep.mubr.msk.bf16.mxu0 %vm58_vm0, %v41_v20  ;;  %1596 = vmatprep.mubr.msk.bf16.mxu1 %vm58_vm0, %v41_v20 }
  0x36   :  { %1579 = vmatmul.mubr.msk.bf16.gmra.mxu0 %vm58_vm0, %v42_v25  ;;  %1597 = vmatmul.mubr.msk.bf16.gmra.mxu1 %vm58_vm0, %v42_v25 }
  0x37   :  { %1582 = vmatprep.mubr.msk.bf16.mxu0 %vm58_vm0, %v43_v26  ;;  %1600 = vmatprep.mubr.msk.bf16.mxu1 %vm58_vm0, %v43_v26 }
  0x3e   :  { %1583 = vmatmul.mubr.msk.bf16.gmra.mxu0 %vm58_vm0, %v44_v29  ;;  %1601 = vmatmul.mubr.msk.bf16.gmra.mxu1 %vm58_vm0, %v44_v29 }
  0x3f   :  { %1608 = vmatprep.mubr.msk.f32.mxu0 %vm58_vm0, %v1710_v2  ;;  %1636 = vmatprep.mubr.msk.f32.mxu1 %vm58_vm0, %v1710_v2 }
  0x46   :  { %1609 = vmatmul.mubr.msk.f32.vlgmr.msra.gmra.mxu0 %vm58_vm0, %v1715_v3  ;;  %1637 = vmatmul.mubr.msk.f32.vlgmr.msra.gmra.mxu1 %vm58_vm0, %v1715_v3 }
  0x47   :  { %1611 = vmatprep.mubr.msk.f32.mxu0 %vm58_vm0, %v1720_v4  ;;  %1639 = vmatprep.mubr.msk.f32.mxu1 %vm58_vm0, %v1720_v4 }
  0x4a   :  { %1612 = vmatmul.mubr.msk.f32.gmra.mxu0 %vm58_vm0, %v1727_v6  ;;  %1640 = vmatmul.mubr.msk.f32.gmra.mxu1 %vm58_vm0, %v1727_v6 }
  0x4b   :  { %1614 = vmatprep.mubr.msk.f32.mxu0 %vm58_vm0, %v1742_v10  ;;  %1642 = vmatprep.mubr.msk.f32.mxu1 %vm58_vm0, %v1742_v10 }
  0x4e   :  { %1615 = vmatmul.mubr.msk.f32.gmra.mxu0 %vm58_vm0, %v1747_v11  ;;  %1643 = vmatmul.mubr.msk.f32.gmra.mxu1 %vm58_vm0, %v1747_v11 }
  0x4f   :  { %1617 = vmatprep.mubr.msk.f32.mxu0 %vm58_vm0, %v1756_v13  ;;  %1645 = vmatprep.mubr.msk.f32.mxu1 %vm58_vm0, %v1756_v13 }
  0x52   :  { %1618 = vmatmul.mubr.msk.f32.gmra.mxu0 %vm58_vm0, %v1761_v14  ;;  %1646 = vmatmul.mubr.msk.f32.gmra.mxu1 %vm58_vm0, %v1761_v14 }
  0x53   :  { %1620 = vmatprep.mubr.msk.f32.mxu0 %vm58_vm0, %v1766_v15  ;;  %1648 = vmatprep.mubr.msk.f32.mxu1 %vm58_vm0, %v1766_v15 }
  0x56   :  { %1621 = vmatmul.mubr.msk.f32.gmra.mxu0 %vm58_vm0, %v1771_v16  ;;  %1649 = vmatmul.mubr.msk.f32.gmra.mxu1 %vm58_vm0, %v1771_v16 }
  0x57   :  { %1623 = vmatprep.mubr.msk.f32.mxu0 %vm58_vm0, %v31_v21  ;;  %1651 = vmatprep.mubr.msk.f32.mxu1 %vm58_vm0, %v31_v21 }
  0x5a   :  { %1624 = vmatmul.mubr.msk.f32.gmra.mxu0 %vm58_vm0, %v32_v22  ;;  %1652 = vmatmul.mubr.msk.f32.gmra.mxu1 %vm58_vm0, %v32_v22 }
  0x5b   :  { %1626 = vmatprep.mubr.msk.f32.mxu0 %vm58_vm0, %v33_v23  ;;  %1654 = vmatprep.mubr.msk.f32.mxu1 %vm58_vm0, %v33_v23 }
  0x5e   :  { %1627 = vmatmul.mubr.msk.f32.gmra.mxu0 %vm58_vm0, %v1801_v24  ;;  %1655 = vmatmul.mubr.msk.f32.gmra.mxu1 %vm58_vm0, %v1801_v24 }
  0x5f   :  { %1629 = vmatprep.mubr.msk.f32.mxu0 %vm58_vm0, %v35_v27  ;;  %1657 = vmatprep.mubr.msk.f32.mxu1 %vm58_vm0, %v35_v27 }
  0x62   :  { %1630 = vmatmul.mubr.msk.f32.gmra.mxu0 %vm58_vm0, %v36_v28  ;;  %1658 = vmatmul.mubr.msk.f32.gmra.mxu1 %vm58_vm0, %v36_v28 }
  0xc6   :  { %v1536_v36 = vpop.f32.mrf.mxu0  ;;  %v1554_v38 = vpop.f32.mrf.mxu1 }
  0xc7   :  { %v126_v37 = vadd.f32 %v1536_v36, %v1892_v35  ;;  %v313_v39 = vadd.f32 %v1554_v38, %v1892_v35 }
  0xc8   :  { %v117_v40 = vpop.f32.mrf.mxu0  ;;  %v304_v43 = vpop.f32.mrf.mxu1 }
  0xc9   :  { %v1398_v41 = vpack.c.bf16 %v126_v37, %v126_v37  ;;  %v118_v42 = vadd.f32 %v1892_v35, %v117_v40  ;;  %v1414_v44 = vpack.c.bf16 %v313_v39, %v313_v39  ;;  %v305_v45 = vadd.f32 %v1892_v35, %v304_v43 }
  0xca   :  { %v1537_v46 = vpop.f32.mrf.mxu0  ;;  %v1555_v49 = vpop.f32.mrf.mxu1 }
  0xcb   :  { %247 = vst.msk [vmem:[%s2346_s4 + $0x8] sm:$0xf] %vm244_vm2, %v1398_v41  ;;  %v1396_v47 = vpack.c.bf16 %v118_v42, %v118_v42  ;;  %v129_v48 = vadd.f32 %v1537_v46, %v1892_v35  ;;  %1264 = vst.msk [vmem:[%s2346_s4 + $0x48] sm:$0xf] %vm244_vm2, %v1414_v44  ;;  %v1412_v50 = vpack.c.bf16 %v305_v45, %v305_v45 }
  0xcc   :  { %v316_v51 = vadd.f32 %v1555_v49, %v1892_v35  ;;  %v120_v52 = vpop.f32.mrf.mxu0  ;;  %v307_v55 = vpop.f32.mrf.mxu1 }
  0xcd   :  { %245 = vst.msk [vmem:[%s2346_s4] sm:$0xf] %vm244_vm2, %v1396_v47  ;;  %v1399_v53 = vpack.c.bf16 %v129_v48, %v129_v48  ;;  %v121_v54 = vadd.f32 %v1892_v35, %v120_v52  ;;  %1262 = vst.msk [vmem:[%s2346_s4 + $0x40] sm:$0xf] %vm244_vm2, %v1412_v50  ;;  %v308_v57 = vadd.f32 %v1892_v35, %v307_v55 }
  0xce   :  { %v1415_v56 = vpack.c.bf16 %v316_v51, %v316_v51  ;;  %v1540_v58 = vpop.f32.mrf.mxu0  ;;  %v1558_v61 = vpop.f32.mrf.mxu1 }
  0xcf   :  { %248 = vst.msk [vmem:[%s2346_s4 + $0xc] sm:$0xf] %vm244_vm2, %v1399_v53  ;;  %v1397_v59 = vpack.c.bf16 %v121_v54, %v121_v54  ;;  %v142_v60 = vadd.f32 %v1540_v58, %v1892_v35  ;;  %v1413_v62 = vpack.c.bf16 %v308_v57, %v308_v57  ;;  %v329_v63 = vadd.f32 %v1558_v61, %v1892_v35 }
  0xd0   :  { %1265 = vst.msk [vmem:[%s2346_s4 + $0x4c] sm:$0xf] %vm244_vm2, %v1415_v56  ;;  %v133_v0 = vpop.f32.mrf.mxu0  ;;  %v320_v3 = vpop.f32.mrf.mxu1 }
  0xd1   :  { %246 = vst.msk [vmem:[%s2346_s4 + $0x4] sm:$0xf] %vm244_vm2, %v1397_v59  ;;  %v1402_v1 = vpack.c.bf16 %v142_v60, %v142_v60  ;;  %v134_v2 = vadd.f32 %v1892_v35, %v133_v0  ;;  %1263 = vst.msk [vmem:[%s2346_s4 + $0x44] sm:$0xf] %vm244_vm2, %v1413_v62  ;;  %v1418_v4 = vpack.c.bf16 %v329_v63, %v329_v63 }
  0xd2   :  { %v321_v5 = vadd.f32 %v1892_v35, %v320_v3  ;;  %v1541_v6 = vpop.f32.mrf.mxu0  ;;  %v1559_v9 = vpop.f32.mrf.mxu1 }
  0xd3   :  { %251 = vst.msk [vmem:[%s2346_s4 + $0x18] sm:$0xf] %vm244_vm2, %v1402_v1  ;;  %v1400_v7 = vpack.c.bf16 %v134_v2, %v134_v2  ;;  %v145_v8 = vadd.f32 %v1541_v6, %v1892_v35  ;;  %1268 = vst.msk [vmem:[%s2346_s4 + $0x58] sm:$0xf] %vm244_vm2, %v1418_v4  ;;  %v332_v11 = vadd.f32 %v1559_v9, %v1892_v35 }
  0xd4   :  { %v1416_v10 = vpack.c.bf16 %v321_v5, %v321_v5  ;;  %v136_v12 = vpop.f32.mrf.mxu0  ;;  %v323_v15 = vpop.f32.mrf.mxu1 }
  0xd5   :  { %249 = vst.msk [vmem:[%s2346_s4 + $0x10] sm:$0xf] %vm244_vm2, %v1400_v7  ;;  %v1403_v13 = vpack.c.bf16 %v145_v8, %v145_v8  ;;  %v137_v14 = vadd.f32 %v1892_v35, %v136_v12  ;;  %v1419_v16 = vpack.c.bf16 %v332_v11, %v332_v11  ;;  %v324_v17 = vadd.f32 %v1892_v35, %v323_v15 }
  0xd6   :  { %1266 = vst.msk [vmem:[%s2346_s4 + $0x50] sm:$0xf] %vm244_vm2, %v1416_v10  ;;  %v1544_v18 = vpop.f32.mrf.mxu0  ;;  %v1562_v21 = vpop.f32.mrf.mxu1 }
  0xd7   :  { %252 = vst.msk [vmem:[%s2346_s4 + $0x1c] sm:$0xf] %vm244_vm2, %v1403_v13  ;;  %v1401_v19 = vpack.c.bf16 %v137_v14, %v137_v14  ;;  %v158_v20 = vadd.f32 %v1544_v18, %v1892_v35  ;;  %1269 = vst.msk [vmem:[%s2346_s4 + $0x5c] sm:$0xf] %vm244_vm2, %v1419_v16  ;;  %v1417_v22 = vpack.c.bf16 %v324_v17, %v324_v17 }
  0xd8   :  { %v345_v23 = vadd.f32 %v1562_v21, %v1892_v35  ;;  %v149_v24 = vpop.f32.mrf.mxu0  ;;  %v336_v27 = vpop.f32.mrf.mxu1 }
  0xd9   :  { %250 = vst.msk [vmem:[%s2346_s4 + $0x14] sm:$0xf] %vm244_vm2, %v1401_v19  ;;  %v1406_v25 = vpack.c.bf16 %v158_v20, %v158_v20  ;;  %v150_v26 = vadd.f32 %v1892_v35, %v149_v24  ;;  %1267 = vst.msk [vmem:[%s2346_s4 + $0x54] sm:$0xf] %vm244_vm2, %v1417_v22  ;;  %v337_v29 = vadd.f32 %v1892_v35, %v336_v27 }
  0xda   :  { %v1422_v28 = vpack.c.bf16 %v345_v23, %v345_v23  ;;  %v1545_v30 = vpop.f32.mrf.mxu0  ;;  %v1563_v33 = vpop.f32.mrf.mxu1 }
  0xdb   :  { %255 = vst.msk [vmem:[%s2346_s4 + $0x28] sm:$0xf] %vm244_vm2, %v1406_v25  ;;  %v1404_v31 = vpack.c.bf16 %v150_v26, %v150_v26  ;;  %v161_v32 = vadd.f32 %v1545_v30, %v1892_v35  ;;  %v1420_v34 = vpack.c.bf16 %v337_v29, %v337_v29  ;;  %v348_v36 = vadd.f32 %v1563_v33, %v1892_v35 }
  0xdc   :  { %1272 = vst.msk [vmem:[%s2346_s4 + $0x68] sm:$0xf] %vm244_vm2, %v1422_v28  ;;  %v152_v37 = vpop.f32.mrf.mxu0  ;;  %v339_v40 = vpop.f32.mrf.mxu1 }
  0xdd   :  { %253 = vst.msk [vmem:[%s2346_s4 + $0x20] sm:$0xf] %vm244_vm2, %v1404_v31  ;;  %v1407_v38 = vpack.c.bf16 %v161_v32, %v161_v32  ;;  %v153_v39 = vadd.f32 %v1892_v35, %v152_v37  ;;  %1270 = vst.msk [vmem:[%s2346_s4 + $0x60] sm:$0xf] %vm244_vm2, %v1420_v34  ;;  %v1423_v41 = vpack.c.bf16 %v348_v36, %v348_v36 }
  0xde   :  { %v340_v42 = vadd.f32 %v1892_v35, %v339_v40  ;;  %v1548_v43 = vpop.f32.mrf.mxu0  ;;  %v1566_v46 = vpop.f32.mrf.mxu1 }
  0xdf   :  { %256 = vst.msk [vmem:[%s2346_s4 + $0x2c] sm:$0xf] %vm244_vm2, %v1407_v38  ;;  %v1405_v44 = vpack.c.bf16 %v153_v39, %v153_v39  ;;  %v174_v45 = vadd.f32 %v1548_v43, %v1892_v35  ;;  %1273 = vst.msk [vmem:[%s2346_s4 + $0x6c] sm:$0xf] %vm244_vm2, %v1423_v41  ;;  %v361_v48 = vadd.f32 %v1566_v46, %v1892_v35 }
  0xe0   :  { %v1421_v47 = vpack.c.bf16 %v340_v42, %v340_v42  ;;  %v165_v49 = vpop.f32.mrf.mxu0  ;;  %v352_v52 = vpop.f32.mrf.mxu1 }
  0xe1   :  { %254 = vst.msk [vmem:[%s2346_s4 + $0x24] sm:$0xf] %vm244_vm2, %v1405_v44  ;;  %v1410_v50 = vpack.c.bf16 %v174_v45, %v174_v45  ;;  %v166_v51 = vadd.f32 %v1892_v35, %v165_v49  ;;  %v1426_v53 = vpack.c.bf16 %v361_v48, %v361_v48  ;;  %v353_v54 = vadd.f32 %v1892_v35, %v352_v52 }
  0xe2   :  { %1271 = vst.msk [vmem:[%s2346_s4 + $0x64] sm:$0xf] %vm244_vm2, %v1421_v47  ;;  %v1549_v55 = vpop.f32.mrf.mxu0  ;;  %v1567_v58 = vpop.f32.mrf.mxu1 }
  0xe3   :  { %259 = vst.msk [vmem:[%s2346_s4 + $0x38] sm:$0xf] %vm244_vm2, %v1410_v50  ;;  %v1408_v56 = vpack.c.bf16 %v166_v51, %v166_v51  ;;  %v177_v57 = vadd.f32 %v1549_v55, %v1892_v35  ;;  %1276 = vst.msk [vmem:[%s2346_s4 + $0x78] sm:$0xf] %vm244_vm2, %v1426_v53  ;;  %v1424_v59 = vpack.c.bf16 %v353_v54, %v353_v54 }
  0xe4   :  { %v364_v60 = vadd.f32 %v1567_v58, %v1892_v35  ;;  %v168_v61 = vpop.f32.mrf.mxu0  ;;  %v355_v0 = vpop.f32.mrf.mxu1 }
  0xe5   :  { %257 = vst.msk [vmem:[%s2346_s4 + $0x30] sm:$0xf] %vm244_vm2, %v1408_v56  ;;  %v1411_v62 = vpack.c.bf16 %v177_v57, %v177_v57  ;;  %v169_v63 = vadd.f32 %v1892_v35, %v168_v61  ;;  %1274 = vst.msk [vmem:[%s2346_s4 + $0x70] sm:$0xf] %vm244_vm2, %v1424_v59  ;;  %v356_v2 = vadd.f32 %v1892_v35, %v355_v0 }
  0xe6   :  { %v1427_v1 = vpack.c.bf16 %v364_v60, %v364_v60  ;;  %v1572_v3 = vpop.f32.mrf.mxu0  ;;  %v1590_v6 = vpop.f32.mrf.mxu1 }
  0xe7   :  { %260 = vst.msk [vmem:[%s2346_s4 + $0x3c] sm:$0xf] %vm244_vm2, %v1411_v62  ;;  %v1409_v4 = vpack.c.bf16 %v169_v63, %v169_v63  ;;  %v500_v5 = vadd.f32 %v1572_v3, %v1892_v35  ;;  %v1425_v7 = vpack.c.bf16 %v356_v2, %v356_v2  ;;  %v687_v8 = vadd.f32 %v1590_v6, %v1892_v35 }
  0xe8   :  { %1277 = vst.msk [vmem:[%s2346_s4 + $0x7c] sm:$0xf] %vm244_vm2, %v1427_v1  ;;  %v491_v9 = vpop.f32.mrf.mxu0  ;;  %v678_v12 = vpop.f32.mrf.mxu1 }
  0xe9   :  { %258 = vst.msk [vmem:[%s2346_s4 + $0x34] sm:$0xf] %vm244_vm2, %v1409_v4  ;;  %v1430_v10 = vpack.c.bf16 %v500_v5, %v500_v5  ;;  %v492_v11 = vadd.f32 %v1892_v35, %v491_v9  ;;  %1275 = vst.msk [vmem:[%s2346_s4 + $0x74] sm:$0xf] %vm244_vm2, %v1425_v7  ;;  %v1446_v13 = vpack.c.bf16 %v687_v8, %v687_v8 }
  0xea   :  { %v679_v14 = vadd.f32 %v1892_v35, %v678_v12  ;;  %v1573_v15 = vpop.f32.mrf.mxu0  ;;  %v1591_v18 = vpop.f32.mrf.mxu1 }
  0xeb   :  { %1307 = vst.msk [vmem:[%s2346_s4 + $0x88] sm:$0xf] %vm244_vm2, %v1430_v10  ;;  %v1428_v16 = vpack.c.bf16 %v492_v11, %v492_v11  ;;  %v503_v17 = vadd.f32 %v1573_v15, %v1892_v35  ;;  %1350 = vst.msk [vmem:[%s2346_s4 + $0xc8] sm:$0xf] %vm244_vm2, %v1446_v13  ;;  %v690_v20 = vadd.f32 %v1591_v18, %v1892_v35 }
  0xec   :  { %v1444_v19 = vpack.c.bf16 %v679_v14, %v679_v14  ;;  %v494_v21 = vpop.f32.mrf.mxu0  ;;  %v681_v24 = vpop.f32.mrf.mxu1 }
  0xed   :  { %1305 = vst.msk [vmem:[%s2346_s4 + $0x80] sm:$0xf] %vm244_vm2, %v1428_v16  ;;  %v1431_v22 = vpack.c.bf16 %v503_v17, %v503_v17  ;;  %v495_v23 = vadd.f32 %v1892_v35, %v494_v21  ;;  %v1447_v25 = vpack.c.bf16 %v690_v20, %v690_v20  ;;  %v682_v26 = vadd.f32 %v1892_v35, %v681_v24 }
  0xee   :  { %1348 = vst.msk [vmem:[%s2346_s4 + $0xc0] sm:$0xf] %vm244_vm2, %v1444_v19  ;;  %v1576_v27 = vpop.f32.mrf.mxu0  ;;  %v1594_v30 = vpop.f32.mrf.mxu1 }
  0xef   :  { %1308 = vst.msk [vmem:[%s2346_s4 + $0x8c] sm:$0xf] %vm244_vm2, %v1431_v22  ;;  %v1429_v28 = vpack.c.bf16 %v495_v23, %v495_v23  ;;  %v516_v29 = vadd.f32 %v1576_v27, %v1892_v35  ;;  %1351 = vst.msk [vmem:[%s2346_s4 + $0xcc] sm:$0xf] %vm244_vm2, %v1447_v25  ;;  %v1445_v31 = vpack.c.bf16 %v682_v26, %v682_v26 }
  0xf0   :  { %v703_v32 = vadd.f32 %v1594_v30, %v1892_v35  ;;  %v507_v33 = vpop.f32.mrf.mxu0  ;;  %v694_v37 = vpop.f32.mrf.mxu1 }
  0xf1   :  { %1306 = vst.msk [vmem:[%s2346_s4 + $0x84] sm:$0xf] %vm244_vm2, %v1429_v28  ;;  %v1434_v34 = vpack.c.bf16 %v516_v29, %v516_v29  ;;  %v508_v36 = vadd.f32 %v1892_v35, %v507_v33  ;;  %1349 = vst.msk [vmem:[%s2346_s4 + $0xc4] sm:$0xf] %vm244_vm2, %v1445_v31  ;;  %v695_v39 = vadd.f32 %v1892_v35, %v694_v37 }
  0xf2   :  { %v1450_v38 = vpack.c.bf16 %v703_v32, %v703_v32  ;;  %v1577_v40 = vpop.f32.mrf.mxu0  ;;  %v1595_v43 = vpop.f32.mrf.mxu1 }
  0xf3   :  { %1311 = vst.msk [vmem:[%s2346_s4 + $0x98] sm:$0xf] %vm244_vm2, %v1434_v34  ;;  %v1432_v41 = vpack.c.bf16 %v508_v36, %v508_v36  ;;  %v519_v42 = vadd.f32 %v1577_v40, %v1892_v35  ;;  %v1448_v44 = vpack.c.bf16 %v695_v39, %v695_v39  ;;  %v706_v45 = vadd.f32 %v1595_v43, %v1892_v35 }
  0xf4   :  { %1354 = vst.msk [vmem:[%s2346_s4 + $0xd8] sm:$0xf] %vm244_vm2, %v1450_v38  ;;  %v510_v46 = vpop.f32.mrf.mxu0  ;;  %v697_v49 = vpop.f32.mrf.mxu1 }
  0xf5   :  { %1309 = vst.msk [vmem:[%s2346_s4 + $0x90] sm:$0xf] %vm244_vm2, %v1432_v41  ;;  %v1435_v47 = vpack.c.bf16 %v519_v42, %v519_v42  ;;  %v511_v48 = vadd.f32 %v1892_v35, %v510_v46  ;;  %1352 = vst.msk [vmem:[%s2346_s4 + $0xd0] sm:$0xf] %vm244_vm2, %v1448_v44  ;;  %v1451_v50 = vpack.c.bf16 %v706_v45, %v706_v45 }
  0xf6   :  { %v698_v51 = vadd.f32 %v1892_v35, %v697_v49  ;;  %v1580_v52 = vpop.f32.mrf.mxu0  ;;  %v1598_v55 = vpop.f32.mrf.mxu1 }
  0xf7   :  { %1312 = vst.msk [vmem:[%s2346_s4 + $0x9c] sm:$0xf] %vm244_vm2, %v1435_v47  ;;  %v1433_v53 = vpack.c.bf16 %v511_v48, %v511_v48  ;;  %v532_v54 = vadd.f32 %v1580_v52, %v1892_v35  ;;  %1355 = vst.msk [vmem:[%s2346_s4 + $0xdc] sm:$0xf] %vm244_vm2, %v1451_v50  ;;  %v719_v57 = vadd.f32 %v1598_v55, %v1892_v35 }
  0xf8   :  { %v1449_v56 = vpack.c.bf16 %v698_v51, %v698_v51  ;;  %v523_v58 = vpop.f32.mrf.mxu0  ;;  %v710_v61 = vpop.f32.mrf.mxu1 }
  0xf9   :  { %1310 = vst.msk [vmem:[%s2346_s4 + $0x94] sm:$0xf] %vm244_vm2, %v1433_v53  ;;  %v1438_v59 = vpack.c.bf16 %v532_v54, %v532_v54  ;;  %v524_v60 = vadd.f32 %v1892_v35, %v523_v58  ;;  %v1454_v62 = vpack.c.bf16 %v719_v57, %v719_v57  ;;  %v711_v63 = vadd.f32 %v1892_v35, %v710_v61 }
  0xfa   :  { %1353 = vst.msk [vmem:[%s2346_s4 + $0xd4] sm:$0xf] %vm244_vm2, %v1449_v56  ;;  %v1581_v0 = vpop.f32.mrf.mxu0  ;;  %v1599_v3 = vpop.f32.mrf.mxu1 }
  0xfb   :  { %1315 = vst.msk [vmem:[%s2346_s4 + $0xa8] sm:$0xf] %vm244_vm2, %v1438_v59  ;;  %v1436_v1 = vpack.c.bf16 %v524_v60, %v524_v60  ;;  %v535_v2 = vadd.f32 %v1581_v0, %v1892_v35  ;;  %1358 = vst.msk [vmem:[%s2346_s4 + $0xe8] sm:$0xf] %vm244_vm2, %v1454_v62  ;;  %v1452_v4 = vpack.c.bf16 %v711_v63, %v711_v63 }
  0xfc   :  { %v722_v5 = vadd.f32 %v1599_v3, %v1892_v35  ;;  %v526_v6 = vpop.f32.mrf.mxu0  ;;  %v713_v9 = vpop.f32.mrf.mxu1 }
  0xfd   :  { %1313 = vst.msk [vmem:[%s2346_s4 + $0xa0] sm:$0xf] %vm244_vm2, %v1436_v1  ;;  %v1439_v7 = vpack.c.bf16 %v535_v2, %v535_v2  ;;  %v527_v8 = vadd.f32 %v1892_v35, %v526_v6  ;;  %1356 = vst.msk [vmem:[%s2346_s4 + $0xe0] sm:$0xf] %vm244_vm2, %v1452_v4  ;;  %v714_v11 = vadd.f32 %v1892_v35, %v713_v9 }
  0xfe   :  { %v1455_v10 = vpack.c.bf16 %v722_v5, %v722_v5  ;;  %v1584_v12 = vpop.f32.mrf.mxu0  ;;  %v1602_v15 = vpop.f32.mrf.mxu1 }
  0xff   :  { %1316 = vst.msk [vmem:[%s2346_s4 + $0xac] sm:$0xf] %vm244_vm2, %v1439_v7  ;;  %v1437_v13 = vpack.c.bf16 %v527_v8, %v527_v8  ;;  %v548_v14 = vadd.f32 %v1584_v12, %v1892_v35  ;;  %v1453_v16 = vpack.c.bf16 %v714_v11, %v714_v11  ;;  %v735_v17 = vadd.f32 %v1602_v15, %v1892_v35 }
 0x100   :  { %1359 = vst.msk [vmem:[%s2346_s4 + $0xec] sm:$0xf] %vm244_vm2, %v1455_v10  ;;  %v539_v18 = vpop.f32.mrf.mxu0  ;;  %v726_v21 = vpop.f32.mrf.mxu1 }
 0x101   :  { %1314 = vst.msk [vmem:[%s2346_s4 + $0xa4] sm:$0xf] %vm244_vm2, %v1437_v13  ;;  %v1442_v19 = vpack.c.bf16 %v548_v14, %v548_v14  ;;  %v540_v20 = vadd.f32 %v1892_v35, %v539_v18  ;;  %1357 = vst.msk [vmem:[%s2346_s4 + $0xe4] sm:$0xf] %vm244_vm2, %v1453_v16  ;;  %v1458_v22 = vpack.c.bf16 %v735_v17, %v735_v17 }
 0x102   :  { %v727_v23 = vadd.f32 %v1892_v35, %v726_v21  ;;  %v1585_v24 = vpop.f32.mrf.mxu0  ;;  %v1603_v27 = vpop.f32.mrf.mxu1 }
 0x103   :  { %1319 = vst.msk [vmem:[%s2346_s4 + $0xb8] sm:$0xf] %vm244_vm2, %v1442_v19  ;;  %v1440_v25 = vpack.c.bf16 %v540_v20, %v540_v20  ;;  %v551_v26 = vadd.f32 %v1585_v24, %v1892_v35  ;;  %1362 = vst.msk [vmem:[%s2346_s4 + $0xf8] sm:$0xf] %vm244_vm2, %v1458_v22  ;;  %v738_v29 = vadd.f32 %v1603_v27, %v1892_v35 }
 0x104   :  { %v1456_v28 = vpack.c.bf16 %v727_v23, %v727_v23  ;;  %v542_v30 = vpop.f32.mrf.mxu0  ;;  %v729_v33 = vpop.f32.mrf.mxu1 }
 0x105   :  { %1317 = vst.msk [vmem:[%s2346_s4 + $0xb0] sm:$0xf] %vm244_vm2, %v1440_v25  ;;  %v1443_v31 = vpack.c.bf16 %v551_v26, %v551_v26  ;;  %v543_v32 = vadd.f32 %v1892_v35, %v542_v30  ;;  %v1459_v34 = vpack.c.bf16 %v738_v29, %v738_v29  ;;  %v730_v36 = vadd.f32 %v1892_v35, %v729_v33 }
 0x106   :  { %1360 = vst.msk [vmem:[%s2346_s4 + $0xf0] sm:$0xf] %vm244_vm2, %v1456_v28  ;;  %v1610_v37 = vpop.f32.mrf.mxu0  ;;  %v1638_v39 = vpop.f32.mrf.mxu1 }
 0x107   :  { %1320 = vst.msk [vmem:[%s2346_s4 + $0xbc] sm:$0xf] %vm244_vm2, %v1443_v31  ;;  %v1441_v38 = vpack.c.bf16 %v543_v32, %v543_v32  ;;  %1363 = vst.msk [vmem:[%s2346_s4 + $0xfc] sm:$0xf] %vm244_vm2, %v1459_v34  ;;  %v1457_v40 = vpack.c.bf16 %v730_v36, %v730_v36 }
 0x108   :  { %1019 = vst.msk [vmem:[%s2347_s5 + $0x8] sm:$0xff] %vm1017_vm3, %v1610_v37  ;;  %1182 = vst.msk [vmem:[%s2348_s6 + $0x8] sm:$0xff] %vm1017_vm3, %v1638_v39  ;;  %v938_v35 = vpop.f32.mrf.mxu0  ;;  %v1102_v41 = vpop.f32.mrf.mxu1 }
 0x109   :  { %1318 = vst.msk [vmem:[%s2346_s4 + $0xb4] sm:$0xf] %vm244_vm2, %v1441_v38  ;;  %1361 = vst.msk [vmem:[%s2346_s4 + $0xf4] sm:$0xf] %vm244_vm2, %v1457_v40 }
 0x10a   :  { %1018 = vst.msk [vmem:[%s2347_s5] sm:$0xff] %vm1017_vm3, %v938_v35  ;;  %1181 = vst.msk [vmem:[%s2348_s6] sm:$0xff] %vm1017_vm3, %v1102_v41  ;;  %v1613_v42 = vpop.f32.mrf.mxu0  ;;  %v1641_v43 = vpop.f32.mrf.mxu1 }
 0x10b   :  { %1021 = vst.msk [vmem:[%s2347_s5 + $0x18] sm:$0xff] %vm1017_vm3, %v1613_v42  ;;  %1184 = vst.msk [vmem:[%s2348_s6 + $0x18] sm:$0xff] %vm1017_vm3, %v1641_v43 }
 0x10c   :  { %v948_v44 = vpop.f32.mrf.mxu0  ;;  %v1112_v45 = vpop.f32.mrf.mxu1 }
 0x10d   :  { %1020 = vst.msk [vmem:[%s2347_s5 + $0x10] sm:$0xff] %vm1017_vm3, %v948_v44  ;;  %1183 = vst.msk [vmem:[%s2348_s6 + $0x10] sm:$0xff] %vm1017_vm3, %v1112_v45 }
 0x10e   :  { %v1616_v46 = vpop.f32.mrf.mxu0  ;;  %v1644_v47 = vpop.f32.mrf.mxu1 }
 0x10f   :  { %1023 = vst.msk [vmem:[%s2347_s5 + $0x28] sm:$0xff] %vm1017_vm3, %v1616_v46  ;;  %1186 = vst.msk [vmem:[%s2348_s6 + $0x28] sm:$0xff] %vm1017_vm3, %v1644_v47 }
 0x110   :  { %v958_v48 = vpop.f32.mrf.mxu0  ;;  %v1122_v49 = vpop.f32.mrf.mxu1 }
 0x111   :  { %1022 = vst.msk [vmem:[%s2347_s5 + $0x20] sm:$0xff] %vm1017_vm3, %v958_v48  ;;  %1185 = vst.msk [vmem:[%s2348_s6 + $0x20] sm:$0xff] %vm1017_vm3, %v1122_v49 }
 0x112   :  { %v1619_v50 = vpop.f32.mrf.mxu0  ;;  %v1647_v51 = vpop.f32.mrf.mxu1 }
 0x113   :  { %1025 = vst.msk [vmem:[%s2347_s5 + $0x38] sm:$0xff] %vm1017_vm3, %v1619_v50  ;;  %1188 = vst.msk [vmem:[%s2348_s6 + $0x38] sm:$0xff] %vm1017_vm3, %v1647_v51 }
 0x114   :  { %v968_v52 = vpop.f32.mrf.mxu0  ;;  %v1132_v53 = vpop.f32.mrf.mxu1 }
 0x115   :  { %1024 = vst.msk [vmem:[%s2347_s5 + $0x30] sm:$0xff] %vm1017_vm3, %v968_v52  ;;  %1187 = vst.msk [vmem:[%s2348_s6 + $0x30] sm:$0xff] %vm1017_vm3, %v1132_v53 }
 0x116   :  { %v1622_v54 = vpop.f32.mrf.mxu0  ;;  %v1650_v55 = vpop.f32.mrf.mxu1 }
 0x117   :  { %1027 = vst.msk [vmem:[%s2347_s5 + $0x48] sm:$0xff] %vm1017_vm3, %v1622_v54  ;;  %1190 = vst.msk [vmem:[%s2348_s6 + $0x48] sm:$0xff] %vm1017_vm3, %v1650_v55 }
 0x118   :  { %v978_v56 = vpop.f32.mrf.mxu0  ;;  %v1142_v57 = vpop.f32.mrf.mxu1 }
 0x119   :  { %1026 = vst.msk [vmem:[%s2347_s5 + $0x40] sm:$0xff] %vm1017_vm3, %v978_v56  ;;  %1189 = vst.msk [vmem:[%s2348_s6 + $0x40] sm:$0xff] %vm1017_vm3, %v1142_v57 }
 0x11a   :  { %v1625_v58 = vpop.f32.mrf.mxu0  ;;  %v1653_v59 = vpop.f32.mrf.mxu1 }
 0x11b   :  { %1029 = vst.msk [vmem:[%s2347_s5 + $0x58] sm:$0xff] %vm1017_vm3, %v1625_v58  ;;  %1192 = vst.msk [vmem:[%s2348_s6 + $0x58] sm:$0xff] %vm1017_vm3, %v1653_v59 }
 0x11c   :  { %v988_v60 = vpop.f32.mrf.mxu0  ;;  %v1152_v61 = vpop.f32.mrf.mxu1 }
 0x11d   :  { %1028 = vst.msk [vmem:[%s2347_s5 + $0x50] sm:$0xff] %vm1017_vm3, %v988_v60  ;;  %1191 = vst.msk [vmem:[%s2348_s6 + $0x50] sm:$0xff] %vm1017_vm3, %v1152_v61 }
 0x11e   :  { %v1628_v62 = vpop.f32.mrf.mxu0  ;;  %v1656_v63 = vpop.f32.mrf.mxu1 }
 0x11f   :  { %1031 = vst.msk [vmem:[%s2347_s5 + $0x68] sm:$0xff] %vm1017_vm3, %v1628_v62  ;;  %1194 = vst.msk [vmem:[%s2348_s6 + $0x68] sm:$0xff] %vm1017_vm3, %v1656_v63 }
 0x120   :  { %v998_v0 = vpop.f32.mrf.mxu0  ;;  %v1162_v1 = vpop.f32.mrf.mxu1 }
 0x121   :  { %1030 = vst.msk [vmem:[%s2347_s5 + $0x60] sm:$0xff] %vm1017_vm3, %v998_v0  ;;  %1193 = vst.msk [vmem:[%s2348_s6 + $0x60] sm:$0xff] %vm1017_vm3, %v1162_v1 }
 0x122   :  { %v1631_v2 = vpop.f32.mrf.mxu0  ;;  %v1659_v3 = vpop.f32.mrf.mxu1 }
 0x123   :  { %1033 = vst.msk [vmem:[%s2347_s5 + $0x78] sm:$0xff] %vm1017_vm3, %v1631_v2  ;;  %1196 = vst.msk [vmem:[%s2348_s6 + $0x78] sm:$0xff] %vm1017_vm3, %v1659_v3 }
 0x124   :  { %v1008_v4 = vpop.f32.mrf.mxu0  ;;  %v1172_v5 = vpop.f32.mrf.mxu1 }
 0x125   :  { %1032 = vst.msk [vmem:[%s2347_s5 + $0x70] sm:$0xff] %vm1017_vm3, %v1008_v4  ;;  %1195 = vst.msk [vmem:[%s2348_s6 + $0x70] sm:$0xff] %vm1017_vm3, %v1172_v5 }

</bundles_post_ra>
